<compile_context>
chip_gen: v5e
topology: v5e:2x2
jax: 0.10.0
libtpu: 0.0.40
codegen_flags: <defaults>
</compile_context>

<pallas_src>
import functools

import jax
import jax.numpy as jnp
from jax.experimental import pallas as pl
from jax.experimental.pallas import tpu as pltpu


_LANE = 128
_SUB = 8
# Zero padding of weights/bias is exact only if every activation maps 0 -> 0.
_ZERO_PRESERVING_ACTS = ("relu", "tanh", "none")


# ------------------------- one-time parameter padding ----------------------- #

def _pad_params(w_stack, b_stack):
    """Zero-pad stacked params to lane-dense tiles. Called ONCE at init."""
    L, K, N = w_stack.shape
    Kp = max(_LANE, -(-K // _LANE) * _LANE)
    Np = max(_LANE, -(-N // _LANE) * _LANE)
    wp = jnp.pad(w_stack, ((0, 0), (0, Kp - K), (0, Np - N)))
    bp = jnp.pad(b_stack, ((0, 0), (0, 0), (0, Np - N)))
    return wp, bp


# ------------------------- Fused Pallas hot path --------------------------- #

def _make_fused_kernel(acts, k_true):
    """Kernel over the whole (small) problem.

    x_ref: (Mp, K)   -- input, K NOT lane-padded
    w_ref: (L, Kp, Np), b_ref: (L, 1, Np) -- padded at init
    o_ref: (L, Mp, Np) -- lane-dense per-layer outputs

    The Python loop over layers is fully unrolled at trace time; the running
    activation `h` stays in vregs between layers (tiny tiles, well under the
    256 KiB vreg file)."""
    def kernel(x_ref, w_ref, b_ref, o_ref):
        h = x_ref[...]                                     # (Mp, K) f32
        for l, act in enumerate(acts):                     # static unroll, L small
            # Layer 0 contracts over the TRUE K (x unpadded); later layers
            # contract over the padded width (chained h is lane-dense and its
            # padded lanes are exactly zero).
            w_l = w_ref[0, :k_true, :] if l == 0 else w_ref[l]
            y = jnp.dot(h, w_l,                            # MXU, f32 accumulation
                        preferred_element_type=jnp.float32)
            y = y + b_ref[l]                               # (1, Np) broadcast
            if act == "relu":
                y = jnp.maximum(y, 0.0)                    # VPU
            elif act == "tanh":
                y = jnp.tanh(y)                            # EUP
            # act == "none": identity
            o_ref[l] = y.astype(o_ref.dtype)               # lane-dense store
            h = y
    return kernel


@functools.partial(jax.jit, static_argnames=("acts", "n_true"))
def _fused_seq_dense_padded(x, w_pad, b_pad, acts, n_true):
    """Run the whole L-layer (matmul + bias + act) chain in one Pallas kernel.

    x:      (M, K)      f32 -- not padded along K
    w_pad:  (L, Kp, Np) f32 -- padded once at construction
    b_pad:  (L, 1, Np)  f32 -- padded once at construction
    returns (L, M, n_true) f32 per-layer outputs.
    """
    assert all(a in _ZERO_PRESERVING_ACTS for a in acts), (
        "zero padding is only exact for activations with f(0) == 0")
    M, K = x.shape
    L, Kp, Np = w_pad.shape
    if L > 1:
        assert Kp == Np, "chained layers require square (padded) weights"

    Mp = -(-M // _SUB) * _SUB
    xp = x if Mp == M else jnp.pad(x, ((0, Mp - M), (0, 0)))

    out = pl.pallas_call(
        _make_fused_kernel(acts, K),
        out_shape=jax.ShapeDtypeStruct((L, Mp, Np), jnp.float32),
        # Grid-less call: whole arrays resident in VMEM (a few hundred KB here),
        # no pipeline / double-buffer machinery for this tiny problem.
        in_specs=[
            pl.BlockSpec(memory_space=pltpu.MemorySpace.VMEM),
            pl.BlockSpec(memory_space=pltpu.MemorySpace.VMEM),
            pl.BlockSpec(memory_space=pltpu.MemorySpace.VMEM),
        ],
        out_specs=pl.BlockSpec(memory_space=pltpu.MemorySpace.VMEM),
    )(xp, w_pad, b_pad)

    if Mp != M or Np != n_true:
        out = out[:, :M, :n_true]
    return out


# --------------------------- Synthetic submodules --------------------------- #
# SeqModels is a generic container in PyTorch; its submodules each return a dict.
# These deterministic dense blocks provide that dict-returning behaviour, with all
# compute done by the fused Pallas kernel above.

class DenseDictBlock:
    def __init__(self, key, in_features, out_features, act, out_name):
        assert act in _ZERO_PRESERVING_ACTS
        kw, kb = jax.random.split(key)
        self.w = jax.random.normal(kw, (in_features, out_features),
                                   dtype=jnp.float32) * 0.1
        self.b = jax.random.normal(kb, (1, out_features),
                                   dtype=jnp.float32) * 0.01
        self.act = act
        self.out_name = out_name
        self.out_features = out_features
        # Padded single-layer stacks, hoisted out of the per-call path.
        self.w_pad, self.b_pad = _pad_params(self.w[None], self.b[None])

    def __call__(self, x):
        # Standalone use: run this block as a 1-layer fused chain.
        if isinstance(x, dict):
            x = x["x"]
        y = _fused_seq_dense_padded(x, self.w_pad, self.b_pad,
                                    (self.act,), self.out_features)[0]
        return {"x": y, self.out_name: y}


class SeqModels:
    """Port of the PyTorch forward:
        out = {}
        for module in modules: x = module(x); out.update(x)
    The whole module chain is executed as ONE fused, jitted Pallas kernel; the
    per-module dicts are then reconstructed and merged with identical semantics
    ("x" ends up aliasing the last module's output)."""

    def __init__(self, modules):
        self.modules_list = list(modules)
        self.acts = tuple(m.act for m in self.modules_list)
        assert all(a in _ZERO_PRESERVING_ACTS for a in self.acts)
        w_stack = jnp.stack([m.w for m in self.modules_list])
        b_stack = jnp.stack([m.b for m in self.modules_list])
        self.n_out = int(w_stack.shape[2])
        # Hoisted: pad the stacked parameters once at construction, not per call.
        self.w_pad, self.b_pad = _pad_params(w_stack, b_stack)

    def __call__(self, x):
        if isinstance(x, dict):
            x = x["x"]
        ys = _fused_seq_dense_padded(x, self.w_pad, self.b_pad,
                                     self.acts, self.n_out)       # (L, M, N)
        out = {}
        for l, module in enumerate(self.modules_list):
            y = ys[l]
            out.update({"x": y, module.out_name: y})   # same merge order as PyTorch
        return out


# ----------------------------------- main ----------------------------------- #

if __name__ == "__main__":
    key = jax.random.PRNGKey(0)
    k_in, k_m1, k_m2, k_m3 = jax.random.split(key, 4)

    batch, seq, hidden = 2, 8, 32
    x = jax.random.normal(k_in, (batch, seq, hidden), dtype=jnp.float32)
    # Flatten (batch, seq) into one token axis so a single fused call sees all
    # tokens (amortizes the pallas_call fixed cost; larger M fills the MXU).
    x2d = x.reshape(batch * seq, hidden)   # [M, K]

    model = SeqModels([
        DenseDictBlock(k_m1, hidden, hidden, act="relu", out_name="feat_a"),
        DenseDictBlock(k_m2, hidden, hidden, act="tanh", out_name="feat_b"),
        DenseDictBlock(k_m3, hidden, hidden, act="none", out_name="feat_c"),
    ])

    out = model(x2d)
    out = jax.tree_util.tree_map(jax.block_until_ready, out)

    # Structural checks: merged dict has all submodule outputs plus threaded "x".
    expected_keys = {"x", "feat_a", "feat_b", "feat_c"}
    assert set(out.keys()) == expected_keys, out.keys()
    for k, v in out.items():
        assert v.shape == (batch * seq, hidden), (k, v.shape)
        assert bool(jnp.all(jnp.isfinite(v))), k

    # Numerical check against a plain-JAX reference of the same forward.
    ref_h = x2d
    ref = {}
    for m in model.modules_list:
        y = ref_h @ m.w + m.b
        if m.act == "relu":
            y = jnp.maximum(y, 0.0)
        elif m.act == "tanh":
            y = jnp.tanh(y)
        ref.update({"x": y, m.out_name: y})
        ref_h = y
    for k in expected_keys:
        assert jnp.allclose(out[k], ref[k], atol=1e-5, rtol=1e-5), k

    # "x" must alias the last module's output (dict-merge semantics).
    assert jnp.array_equal(out["x"], out["feat_c"])

    print("KERNEL_OK")
</pallas_src>

<mosaic_0001>
module attributes {stable_mosaic.version = 11 : i64} {
  func.func @kernel(%arg0: memref<16x32xf32, #tpu.memory_space<vmem>>, %arg1: memref<3x128x128xf32, #tpu.memory_space<vmem>>, %arg2: memref<3x1x128xf32, #tpu.memory_space<vmem>>, %arg3: memref<3x16x128xf32, #tpu.memory_space<vmem>>) attributes {dimension_semantics = [], scalar_prefetch = 0 : i64, scratch_operands = 0 : i64, tpu.core_type = #tpu.core_type<tc>} {
    %c0 = arith.constant 0 : index
    %c0_0 = arith.constant 0 : index
    %0 = vector.load %arg0[%c0, %c0_0] : memref<16x32xf32, #tpu.memory_space<vmem>>, vector<16x32xf32>
    %c0_1 = arith.constant 0 : index
    %c0_2 = arith.constant 0 : index
    %c0_3 = arith.constant 0 : index
    %1 = vector.load %arg1[%c0_1, %c0_2, %c0_3] : memref<3x128x128xf32, #tpu.memory_space<vmem>>, vector<1x32x128xf32>
    %2 = vector.shape_cast %1 : vector<1x32x128xf32> to vector<32x128xf32>
    %cst = arith.constant dense<0.000000e+00> : vector<16x128xf32>
    %3 = tpu.matmul %0, %2, %cst {dimension_numbers = #tpu.dot_dimension_numbers<[1], [0], [0], [1], [0, 0, 1, 1], [], []>} : vector<16x32xf32>, vector<32x128xf32>, vector<16x128xf32> -> vector<16x128xf32>
    %c0_4 = arith.constant 0 : index
    %c0_5 = arith.constant 0 : index
    %c0_6 = arith.constant 0 : index
    %4 = vector.load %arg2[%c0_4, %c0_5, %c0_6] : memref<3x1x128xf32, #tpu.memory_space<vmem>>, vector<1x1x128xf32>
    %5 = vector.shape_cast %4 : vector<1x1x128xf32> to vector<1x128xf32>
    %6 = vector.broadcast %5 : vector<1x128xf32> to vector<16x128xf32>
    %7 = arith.addf %3, %6 : vector<16x128xf32>
    %cst_7 = arith.constant 0.000000e+00 : f32
    %8 = vector.broadcast %cst_7 : f32 to vector<16x128xf32>
    %9 = arith.maximumf %7, %8 : vector<16x128xf32>
    %c0_8 = arith.constant 0 : index
    %c0_9 = arith.constant 0 : index
    %c0_10 = arith.constant 0 : index
    %10 = vector.load %arg3[%c0_8, %c0_9, %c0_10] : memref<3x16x128xf32, #tpu.memory_space<vmem>>, vector<1x16x128xf32>
    %11 = vector.shape_cast %10 : vector<1x16x128xf32> to vector<16x128xf32>
    %12 = vector.shape_cast %9 : vector<16x128xf32> to vector<1x16x128xf32>
    tpu.vector_store %arg3[%c0_8, %c0_9, %c0_10], %12 {strides = array<i32>} : memref<3x16x128xf32, #tpu.memory_space<vmem>>, vector<1x16x128xf32>,
    %c1 = arith.constant 1 : index
    %c0_11 = arith.constant 0 : index
    %c0_12 = arith.constant 0 : index
    %13 = vector.load %arg1[%c1, %c0_11, %c0_12] : memref<3x128x128xf32, #tpu.memory_space<vmem>>, vector<1x128x128xf32>
    %14 = vector.shape_cast %13 : vector<1x128x128xf32> to vector<128x128xf32>
    %cst_13 = arith.constant dense<0.000000e+00> : vector<16x128xf32>
    %15 = tpu.matmul %9, %14, %cst_13 {dimension_numbers = #tpu.dot_dimension_numbers<[1], [0], [0], [1], [0, 0, 1, 1], [], []>} : vector<16x128xf32>, vector<128x128xf32>, vector<16x128xf32> -> vector<16x128xf32>
    %c1_14 = arith.constant 1 : index
    %c0_15 = arith.constant 0 : index
    %c0_16 = arith.constant 0 : index
    %16 = vector.load %arg2[%c1_14, %c0_15, %c0_16] : memref<3x1x128xf32, #tpu.memory_space<vmem>>, vector<1x1x128xf32>
    %17 = vector.shape_cast %16 : vector<1x1x128xf32> to vector<1x128xf32>
    %18 = vector.broadcast %17 : vector<1x128xf32> to vector<16x128xf32>
    %19 = arith.addf %15, %18 : vector<16x128xf32>
    %20 = math.tanh %19 : vector<16x128xf32>
    %c1_17 = arith.constant 1 : index
    %c0_18 = arith.constant 0 : index
    %c0_19 = arith.constant 0 : index
    %21 = vector.load %arg3[%c1_17, %c0_18, %c0_19] : memref<3x16x128xf32, #tpu.memory_space<vmem>>, vector<1x16x128xf32>
    %22 = vector.shape_cast %21 : vector<1x16x128xf32> to vector<16x128xf32>
    %23 = vector.shape_cast %20 : vector<16x128xf32> to vector<1x16x128xf32>
    tpu.vector_store %arg3[%c1_17, %c0_18, %c0_19], %23 {strides = array<i32>} : memref<3x16x128xf32, #tpu.memory_space<vmem>>, vector<1x16x128xf32>,
    %c2 = arith.constant 2 : index
    %c0_20 = arith.constant 0 : index
    %c0_21 = arith.constant 0 : index
    %24 = vector.load %arg1[%c2, %c0_20, %c0_21] : memref<3x128x128xf32, #tpu.memory_space<vmem>>, vector<1x128x128xf32>
    %25 = vector.shape_cast %24 : vector<1x128x128xf32> to vector<128x128xf32>
    %cst_22 = arith.constant dense<0.000000e+00> : vector<16x128xf32>
    %26 = tpu.matmul %20, %25, %cst_22 {dimension_numbers = #tpu.dot_dimension_numbers<[1], [0], [0], [1], [0, 0, 1, 1], [], []>} : vector<16x128xf32>, vector<128x128xf32>, vector<16x128xf32> -> vector<16x128xf32>
    %c2_23 = arith.constant 2 : index
    %c0_24 = arith.constant 0 : index
    %c0_25 = arith.constant 0 : index
    %27 = vector.load %arg2[%c2_23, %c0_24, %c0_25] : memref<3x1x128xf32, #tpu.memory_space<vmem>>, vector<1x1x128xf32>
    %28 = vector.shape_cast %27 : vector<1x1x128xf32> to vector<1x128xf32>
    %29 = vector.broadcast %28 : vector<1x128xf32> to vector<16x128xf32>
    %30 = arith.addf %26, %29 : vector<16x128xf32>
    %c2_26 = arith.constant 2 : index
    %c0_27 = arith.constant 0 : index
    %c0_28 = arith.constant 0 : index
    %31 = vector.load %arg3[%c2_26, %c0_27, %c0_28] : memref<3x16x128xf32, #tpu.memory_space<vmem>>, vector<1x16x128xf32>
    %32 = vector.shape_cast %31 : vector<1x16x128xf32> to vector<16x128xf32>
    %33 = vector.shape_cast %30 : vector<16x128xf32> to vector<1x16x128xf32>
    tpu.vector_store %arg3[%c2_26, %c0_27, %c0_28], %33 {strides = array<i32>} : memref<3x16x128xf32, #tpu.memory_space<vmem>>, vector<1x16x128xf32>,
    return
  }
}

</mosaic_0001>

<bundles_post_ra>
// kernel: _fused_seq_dense_padded.1
= control target key start
LH: loop header
LB: loop body
LE: loop exit
PB: predicated region body
PF: predicated region fallthrough
CT: control target
= control target key end

     0   :  { %8 = vsyncpa [#allocation3], 0  ;;  %s410_s0 = inlined_call_operand.hbm [shape: f32[16,32], index: 0, kind: input, shape index: {}]   ;;  %s411_s1 = inlined_call_operand.hbm [shape: f32[3,128,128], index: 1, kind: input, shape index: {}]   ;;  %s412_s2 = inlined_call_operand.hbm [shape: f32[3,1,128], index: 2, kind: input, shape index: {}]   ;;  %s413_s3 = inlined_call_operand.hbm [shape: f32[3,16,128], index: 3, kind: output, shape index: {}]  }
   0x1   :  { %9 = vsyncpa [#allocation6], 0 }
   0x2   :  { %10 = vsyncpa [#allocation4], 0  ;;  %s28_s14 = sshll.u32 %s411_s1, 4  ;;  %s359_s15 = smov [#allocation5]   ;;  %s29_s14 = int_to_ptr.hbm [resolvable:$true] %s28_s14 }
   0x3   :  { %s30_s16 = sshll.u32 %s359_s15, 4  ;;  %s15_s19 = sshll.u32 %s410_s0, 4  ;;  %s31_s16 = int_to_ptr.vmem [resolvable:$true] %s30_s16  ;;  %s16_s19 = int_to_ptr.hbm [resolvable:$true] %s15_s19 }
   0x4   :  { %s360_s20 = smov 128   ;;  %s361_s21 = smov 8  }
   0x5   :  { %36 = dma.hbm_to_vmem [thread:$0]  %s29_s14, 6144, %s31_s16, [#allocation6], %s360_s20, %s360_s20, %s361_s21  }
   0x6   :  { %s362_s22 = smov [#allocation2]   ;;  %s41_s1 = sshll.u32 %s412_s2, 4  ;;  %s42_s1 = int_to_ptr.hbm [resolvable:$true] %s41_s1 }
   0x7   :  { %s17_s23 = sshll.u32 %s362_s22, 4  ;;  %s363_s0 = smov [#allocation7]   ;;  %s18_s23 = int_to_ptr.vmem [resolvable:$true] %s17_s23 }
   0x8   :  { %23 = dma.hbm_to_vmem [thread:$0]  %s16_s19, 256, %s18_s23, [#allocation3], %s360_s20, %s360_s20, %s361_s21  }
   0x9   :  { %s43_s26 = sshll.u32 %s363_s0, 4  ;;  %s364_s27 = smov 16   ;;  %s44_s26 = int_to_ptr.vmem [resolvable:$true] %s43_s26 }
   0xa   :  { %s365_s28 = smov 1  }
   0xb   :  { %49 = dma.hbm_to_vmem [thread:$0]  %s42_s1, 48, %s44_s26, [#allocation6], %s364_s27, %s364_s27, %s365_s28  }
   0xc   :  { %353 = dma.done.wait [#allocation3], 256  }
   0xd   :  { %354 = vsyncadd [#allocation3], 4294967040 }
   0xe   :  { %355 = dma.done.wait [#allocation6], 6192  }
   0xf   :  { %356 = vsyncadd [#allocation6], 4294961104  ;;  %v67_v0 = vld [vmem:[#allocation5 + $0x18] sm:$0xff]  ;;  %v66_v1 = vld [vmem:[#allocation5 + $0x10] sm:$0xff]  ;;  %vm72_vm0 = vcmask 261120   ;;  %s366_s2 = smov [#allocation8]  }
  0x10   :  { %91 = vmatpush.msra.mxu0 %v67_v0  ;;  %v65_v2 = vld [vmem:[#allocation5 + $0x8] sm:$0xff]  ;;  %v122_v3 = vld [vmem:[#allocation5 + $0xf8] sm:$0xff]  ;;  %v121_v4 = vld [vmem:[#allocation5 + $0xf0] sm:$0xff]  ;;  %s208_s29 = sshll.u32 %s366_s2, 4  ;;  %s210_s5 = sshll.u32 %s413_s3, 4  ;;  %s209_s29 = int_to_ptr.vmem [resolvable:$true] %s208_s29  ;;  %s211_s5 = int_to_ptr.hbm [resolvable:$true] %s210_s5 }
  0x11   :  { %128 = vmatpush.msra.mxu1 %v122_v3  ;;  %v64_v5 = vld [vmem:[#allocation5] sm:$0xff]  ;;  %v120_v6 = vld [vmem:[#allocation5 + $0xe8] sm:$0xff]  ;;  %226 = vmatpush.msra.mxu3 %v122_v3  ;;  %v62_v7 = vld [vmem:[#allocation2] sm:$0xff] }
  0x12   :  { %92 = vmatpush.msra.mxu0 %v66_v1  ;;  %v119_v8 = vld [vmem:[#allocation5 + $0xe0] sm:$0xff]  ;;  %v118_v9 = vld [vmem:[#allocation5 + $0xd8] sm:$0xff]  ;;  %v117_v10 = vld [vmem:[#allocation5 + $0xd0] sm:$0xff] }
  0x13   :  { %129 = vmatpush.msra.mxu1 %v121_v4  ;;  %227 = vmatpush.msra.mxu3 %v121_v4  ;;  %v116_v11 = vld [vmem:[#allocation5 + $0xc8] sm:$0xff]  ;;  %v63_v12 = vld [vmem:[#allocation2 + $0x8] sm:$0xff]  ;;  %v115_v13 = vld [vmem:[#allocation5 + $0xc0] sm:$0xff] }
  0x14   :  { %93 = vmatpush.msra.mxu0 %v65_v2  ;;  %v114_v14 = vld [vmem:[#allocation5 + $0xb8] sm:$0xff]  ;;  %v113_v15 = vld [vmem:[#allocation5 + $0xb0] sm:$0xff]  ;;  %v112_v16 = vld [vmem:[#allocation5 + $0xa8] sm:$0xff] }
  0x15   :  { %130 = vmatpush.msra.mxu1 %v120_v6  ;;  %228 = vmatpush.msra.mxu3 %v120_v6  ;;  %v111_v17 = vld [vmem:[#allocation5 + $0xa0] sm:$0xff]  ;;  %v110_v18 = vld [vmem:[#allocation5 + $0x98] sm:$0xff]  ;;  %v109_v19 = vld [vmem:[#allocation5 + $0x90] sm:$0xff] }
  0x16   :  { %94 = vmatpush.msra.mxu0 %v64_v5  ;;  %v108_v20 = vld [vmem:[#allocation5 + $0x88] sm:$0xff]  ;;  %v107_v21 = vld [vmem:[#allocation5 + $0x80] sm:$0xff]  ;;  %v172_v22 = vld [vmem:[#allocation5 + $0x178] sm:$0xff] }
  0x17   :  { %224 = vmatmul.msk.f32.vlgmr.msra.gmra.mxu0 %vm72_vm0, %v62_v7  ;;  %131 = vmatpush.msra.mxu1 %v119_v8  ;;  %v171_v23 = vld [vmem:[#allocation5 + $0x170] sm:$0xff]  ;;  %v170_v24 = vld [vmem:[#allocation5 + $0x168] sm:$0xff]  ;;  %v169_v25 = vld [vmem:[#allocation5 + $0x160] sm:$0xff] }
  0x18   :  { %229 = vmatpush.msra.mxu3 %v119_v8  ;;  %178 = vmatpush.msra.mxu2 %v172_v22  ;;  %v168_v26 = vld [vmem:[#allocation5 + $0x158] sm:$0xff]  ;;  %v167_v27 = vld [vmem:[#allocation5 + $0x150] sm:$0xff]  ;;  %v166_v28 = vld [vmem:[#allocation5 + $0x148] sm:$0xff] }
  0x19   :  { %132 = vmatpush.msra.mxu1 %v118_v9  ;;  %v165_v29 = vld [vmem:[#allocation5 + $0x140] sm:$0xff]  ;;  %v164_v30 = vld [vmem:[#allocation5 + $0x138] sm:$0xff]  ;;  %v163_v32 = vld [vmem:[#allocation5 + $0x130] sm:$0xff] }
  0x1a   :  { %230 = vmatpush.msra.mxu3 %v118_v9  ;;  %179 = vmatpush.msra.mxu2 %v171_v23  ;;  %v250_v31 = vld [vmem:[#allocation7] ss:$0 sm:$0xff]  ;;  %v162_v33 = vld [vmem:[#allocation5 + $0x128] sm:$0xff]  ;;  %v160_v41 = vld [vmem:[#allocation5 + $0x118] sm:$0xff] }
  0x1b   :  { %133 = vmatpush.msra.mxu1 %v117_v10  ;;  %v161_v40 = vld [vmem:[#allocation5 + $0x120] sm:$0xff]  ;;  %v159_v42 = vld [vmem:[#allocation5 + $0x110] sm:$0xff]  ;;  %v158_v43 = vld [vmem:[#allocation5 + $0x108] sm:$0xff] }
  0x1c   :  { %231 = vmatpush.msra.mxu3 %v117_v10  ;;  %180 = vmatpush.msra.mxu2 %v170_v24  ;;  %v157_v44 = vld [vmem:[#allocation5 + $0x100] sm:$0xff] }
  0x1d   :  { %134 = vmatpush.msra.mxu1 %v116_v11  ;;  %v251_v45 = vld [vmem:[#allocation7 + $0x1] ss:$0 sm:$0xff]  ;;  %v252_v52 = vld [vmem:[#allocation7 + $0x2] ss:$0 sm:$0xff] }
  0x1e   :  { %232 = vmatpush.msra.mxu3 %v116_v11  ;;  %181 = vmatpush.msra.mxu2 %v169_v25 }
  0x1f   :  { %225 = vmatmul.msk.f32.gmra.mxu0 %vm72_vm0, %v63_v12  ;;  %135 = vmatpush.msra.mxu1 %v115_v13 }
  0x20   :  { %233 = vmatpush.msra.mxu3 %v115_v13  ;;  %182 = vmatpush.msra.mxu2 %v168_v26 }
  0x21   :  { %136 = vmatpush.msra.mxu1 %v114_v14 }
  0x22   :  { %234 = vmatpush.msra.mxu3 %v114_v14  ;;  %183 = vmatpush.msra.mxu2 %v167_v27 }
  0x23   :  { %137 = vmatpush.msra.mxu1 %v113_v15 }
  0x24   :  { %235 = vmatpush.msra.mxu3 %v113_v15  ;;  %184 = vmatpush.msra.mxu2 %v166_v28 }
  0x25   :  { %138 = vmatpush.msra.mxu1 %v112_v16 }
  0x26   :  { %236 = vmatpush.msra.mxu3 %v112_v16  ;;  %185 = vmatpush.msra.mxu2 %v165_v29 }
  0x27   :  { %139 = vmatpush.msra.mxu1 %v111_v17 }
  0x28   :  { %237 = vmatpush.msra.mxu3 %v111_v17  ;;  %186 = vmatpush.msra.mxu2 %v164_v30 }
  0x29   :  { %140 = vmatpush.msra.mxu1 %v110_v18 }
  0x2a   :  { %238 = vmatpush.msra.mxu3 %v110_v18  ;;  %187 = vmatpush.msra.mxu2 %v163_v32 }
  0x2b   :  { %141 = vmatpush.msra.mxu1 %v109_v19 }
  0x2c   :  { %239 = vmatpush.msra.mxu3 %v109_v19  ;;  %188 = vmatpush.msra.mxu2 %v162_v33 }
  0x2d   :  { %142 = vmatpush.msra.mxu1 %v108_v20 }
  0x2e   :  { %240 = vmatpush.msra.mxu3 %v108_v20  ;;  %189 = vmatpush.msra.mxu2 %v161_v40 }
  0x2f   :  { %143 = vmatpush.msra.mxu1 %v107_v21 }
  0x30   :  { %241 = vmatpush.msra.mxu3 %v107_v21  ;;  %190 = vmatpush.msra.mxu2 %v160_v41 }
  0x32   :  { %191 = vmatpush.msra.mxu2 %v159_v42 }
  0x34   :  { %192 = vmatpush.msra.mxu2 %v158_v43 }
  0x36   :  { %193 = vmatpush.msra.mxu2 %v157_v44 }
  0x94   :  { %v96_v34 = vpop.f32.mrf.mxu0 }
  0x95   :  { %v97_v35 = vadd.f32 %v250_v31, %v96_v34 }
  0x97   :  { %v102_v36 = vmax.f32 %v97_v35, 0.0 }
  0x99   :  { %104 = vst [vmem:[#allocation8] sm:$0xff] %v102_v36  ;;  %144 = vmatmul.f32.vlgmr.msra.gmra.mxu1 %v102_v36 }
  0x9c   :  { %v99_v37 = vpop.f32.mrf.mxu0 }
  0x9d   :  { %v100_v38 = vadd.f32 %v250_v31, %v99_v37 }
  0x9f   :  { %v103_v39 = vmax.f32 %v100_v38, 0.0 }
  0xa1   :  { %105 = vst [vmem:[#allocation8 + $0x8] sm:$0xff] %v103_v39  ;;  %147 = vmatmul.f32.vlgmr.msra.gmra.mxu3 %v103_v39 }
 0x116   :  { %v145_v46 = vpop.f32.mrf.mxu1 }
 0x117   :  { %v146_v47 = vadd.f32 %v251_v45, %v145_v46 }
 0x119   :  { %253 = vtanh.f32 %v146_v47 }
 0x11f   :  { %v254_v48 = vpop.eup %253 }
 0x120   :  { %154 = vst [vmem:[#allocation8 + $0x10] sm:$0xff] %v254_v48  ;;  %194 = vmatmul.f32.vlgmr.msra.gmra.mxu2 %v254_v48 }
 0x124   :  { %v148_v49 = vpop.f32.mrf.mxu3 }
 0x125   :  { %v149_v50 = vadd.f32 %v251_v45, %v148_v49 }
 0x127   :  { %255 = vtanh.f32 %v149_v50 }
 0x12d   :  { %v256_v51 = vpop.eup %255 }
 0x12e   :  { %155 = vst [vmem:[#allocation8 + $0x18] sm:$0xff] %v256_v51  ;;  %197 = vmatmul.f32.gmra.mxu2 %v256_v51 }
 0x1a3   :  { %v195_v53 = vpop.f32.mrf.mxu2 }
 0x1a4   :  { %v196_v54 = vadd.f32 %v252_v52, %v195_v53 }
 0x1a6   :  { %202 = vst [vmem:[#allocation8 + $0x20] sm:$0xff] %v196_v54 }
 0x1b1   :  { %v198_v55 = vpop.f32.mrf.mxu2 }
 0x1b2   :  { %v199_v56 = vadd.f32 %v252_v52, %v198_v55 }
 0x1b4   :  { %203 = vst [vmem:[#allocation8 + $0x28] sm:$0xff] %v199_v56 }
 0x1b5   :  { %216 = dma.vmem_to_hbm [thread:$0]  %s209_s29, 768, %s211_s5, [#allocation4], %s360_s20, %s360_s20, %s361_s21  }
 0x1b6   :  { %357 = dma.done.wait [#allocation4], 768  }
 0x1b7   :  { %358 = vsyncadd [#allocation4], 4294966528 }
 0x1b8   :  { %221 = vsyncpa [#allocation3], 1 }
 0x1b9   :  { %222 = vsyncpa [#allocation6], 1 }
 0x1ba   :  { %223 = vsyncpa [#allocation4], 1 }

</bundles_post_ra>
